<compile_context>
chip_gen: v7x
topology: tpu7x:2x2x1
jax: 0.10.0
libtpu: 0.0.40
codegen_flags: <defaults>
</compile_context>

<pallas_src>
import math

import jax
import jax.numpy as jnp
from jax.experimental import pallas as pl
from jax.experimental.pallas import tpu as pltpu


def _round_up(a, k):
    return ((a + k - 1) // k) * k


def _rating_decoder_block_kernel(x_ref, w_ref, b_ref, o_ref):
    # x_ref: (C, TR, 128)   dense tile: channels on axis 0, spatial as
    #                       (rows, lanes) -> every vreg fully packed.
    # w_ref: (b*C*C,) SMEM  folded weights  w_full[b,o,i] = s2*W*s0*g*sqrt(C)
    # b_ref: (b*C,)   SMEM  folded bias     b_full[b,o]   = s2*(W@s1 + bias)
    # o_ref: (C, TR, 128)   output tile
    bi = pl.program_id(0)
    C = x_ref.shape[0]

    # Hoist every SMEM scalar read (and implied broadcast) above vector work.
    w = [[w_ref[bi * C * C + o * C + i] for i in range(C)] for o in range(C)]
    bb = [b_ref[bi * C + o] for o in range(C)]

    x = x_ref[...].astype(jnp.float32)                        # (C, TR, 128)

    # F.normalize(x, dim=channel): x / max(||x||_2, 1e-12) per spatial pos.
    sq = jnp.sum(x * x, axis=0)                               # (TR, 128)
    inv = jax.lax.rsqrt(jnp.maximum(sq, jnp.float32(1e-24)))  # EUP rsqrt
    y = x * inv                                               # (C, TR, 128)

    # Channel mix on the VPU (C=4 would waste >99% of the MXU); each output
    # channel is written directly -> no concatenate / no extra VMEM temp.
    for o in range(C):
        acc = bb[o] + w[o][0] * y[0]
        for i in range(1, C):
            acc = acc + w[o][i] * y[i]
        o_ref[o] = (acc + x[o]).astype(o_ref.dtype)           # residual


def rating_decoder_block(noise_map, g, scale0, scale1, scale2, conv_w, conv_b):
    """noise_map: (b, c, n, m) NCHW; scales: (b, c, 1, 1); g: (1, c, 1, 1)."""
    b, c, n, m = noise_map.shape
    S = n * m
    dtype = noise_map.dtype
    itemsize = jnp.dtype(dtype).itemsize

    # ---- lane-dense spatial layout: (b, C, S) -> (b, C, rows, 128) ----
    r_total = _round_up(S, 128) // 128

    # Target ~8 MiB per input tile (2 in + 2 out pipelined buffers ~= 32 MiB:
    # safe on v7x's 64 MiB VMEM, amortizes the ~0.35us/step overhead).
    MAX_TILE_BYTES = 8 << 20
    max_rows = max(8, ((MAX_TILE_BYTES // (c * 128 * itemsize)) // 8) * 8)

    if r_total > max_rows:
        tr = max_rows                                   # multiple of 8
    elif b == 1 and r_total >= 32:
        tr = _round_up((r_total + 1) // 2, 8)           # >=2 steps for megacore
    else:
        tr = r_total                                    # full extent block
    r_padded = _round_up(r_total, tr)
    S_padded = r_padded * 128

    x = noise_map.reshape(b, c, S)
    if S_padded != S:
        x = jnp.pad(x, ((0, 0), (0, 0), (0, S_padded - S)))
    x = x.reshape(b, c, r_padded, 128)

    # ---- fold the whole affine chain into per-batch weight / bias tables ----
    #   out = w_full @ (x * inv_norm) + b_full + x
    gv = g.reshape(c).astype(jnp.float32)
    s0 = scale0.reshape(b, c).astype(jnp.float32)
    s1 = scale1.reshape(b, c).astype(jnp.float32)
    s2 = scale2.reshape(b, c).astype(jnp.float32)
    W = conv_w.reshape(c, c).astype(jnp.float32)
    bias = conv_b.reshape(c).astype(jnp.float32)

    in_gain = s0 * gv[None, :] * jnp.float32(math.sqrt(c))            # (b, c)
    w_full = s2[:, :, None] * W[None, :, :] * in_gain[:, None, :]     # (b,c,c)
    b_full = s2 * (s1 @ W.T + bias[None, :])                          # (b, c)
    w_full = w_full.reshape(b * c * c)   # 1-D SMEM: no [8,128] row padding
    b_full = b_full.reshape(b * c)

    tile_bytes = c * tr * 128 * itemsize
    vmem_limit = int(min(max(32 << 20, 4 * tile_bytes + (8 << 20)), 48 << 20))

    grid = (b, r_padded // tr)
    out = pl.pallas_call(
        _rating_decoder_block_kernel,
        out_shape=jax.ShapeDtypeStruct((b, c, r_padded, 128), dtype),
        grid=grid,
        in_specs=[
            pl.BlockSpec((None, c, tr, 128), lambda bi, si: (bi, 0, si, 0)),
            pl.BlockSpec(memory_space=pltpu.MemorySpace.SMEM),            # w
            pl.BlockSpec(memory_space=pltpu.MemorySpace.SMEM),            # b
        ],
        out_specs=pl.BlockSpec((None, c, tr, 128),
                               lambda bi, si: (bi, 0, si, 0)),
        compiler_params=pltpu.CompilerParams(
            dimension_semantics=("parallel", "parallel"),
            vmem_limit_bytes=vmem_limit),
    )(x, w_full, b_full)

    out = out.reshape(b, c, S_padded)
    if S_padded != S:
        out = out[:, :, :S]
    return out.reshape(b, c, n, m)


def _reference(noise_map, g, scale0, scale1, scale2, conv_w, conv_b):
    """Pure-JAX reference mirroring the PyTorch forward (NCHW)."""
    x = noise_map.astype(jnp.float32)
    c = x.shape[1]
    denom = jnp.maximum(
        jnp.sqrt(jnp.sum(x * x, axis=1, keepdims=True)), 1e-12)
    y = (x / denom) * g * (c ** 0.5)
    y = scale0 * y + scale1
    # 1x1 conv, NCHW
    z = jnp.einsum('bihw,oi->bohw', y, conv_w.reshape(c, c)) + \
        conv_b.reshape(1, c, 1, 1)
    return scale2 * z + x


if __name__ == "__main__":
    key = jax.random.PRNGKey(0)
    b, c, n, m = 2, 4, 16, 16

    k1, k2, k3, k4, k5, k6 = jax.random.split(key, 6)
    noise_map = jax.random.normal(k1, (b, c, n, m), dtype=jnp.float32)
    scale0 = jax.random.normal(k2, (b, c, 1, 1), dtype=jnp.float32)
    scale1 = jax.random.normal(k3, (b, c, 1, 1), dtype=jnp.float32)
    scale2 = jax.random.normal(k4, (b, c, 1, 1), dtype=jnp.float32)

    # Deterministic parameter init (RMSNorm gain = ones, conv weight/bias random).
    g = jnp.ones((1, c, 1, 1), dtype=jnp.float32)
    conv_w = jax.random.normal(k5, (c, c), dtype=jnp.float32) / math.sqrt(c)
    conv_b = jax.random.normal(k6, (c,), dtype=jnp.float32) * 0.1

    out = rating_decoder_block(noise_map, g, scale0, scale1, scale2,
                               conv_w, conv_b)
    out = jax.block_until_ready(out)

    ref = _reference(noise_map, g, scale0, scale1, scale2, conv_w, conv_b)
    assert out.shape == (b, c, n, m)
    assert jnp.allclose(out, ref, atol=2e-5, rtol=2e-5)

    print("KERNEL_OK")
</pallas_src>

<mosaic_0001>
module attributes {stable_mosaic.version = 11 : i64} {
  func.func @_rating_decoder_block_kernel(%arg0: i32, %arg1: i32, %arg2: memref<1x4x2x128xf32, #tpu.memory_space<vmem>>, %arg3: memref<32xf32, #tpu.memory_space<smem>>, %arg4: memref<8xf32, #tpu.memory_space<smem>>, %arg5: memref<1x4x2x128xf32, #tpu.memory_space<vmem>>) attributes {dimension_semantics = [#tpu.dimension_semantics<parallel>, #tpu.dimension_semantics<parallel>], iteration_bounds = array<i64: 2, 1>, scalar_prefetch = 0 : i64, scratch_operands = 0 : i64, tpu.core_type = #tpu.core_type<tc>, window_params = [{transform_indices = @transform_0, window_bounds = array<i64: 1, 4, 2, 128>}, {transform_indices = @transform_1, window_bounds = array<i64: 32>}, {transform_indices = @transform_2, window_bounds = array<i64: 8>}, {transform_indices = @transform_3, window_bounds = array<i64: 1, 4, 2, 128>}]} {
    %c4_i32 = arith.constant 4 : i32
    %0 = arith.muli %arg0, %c4_i32 : i32
    %c4_i32_0 = arith.constant 4 : i32
    %1 = arith.muli %0, %c4_i32_0 : i32
    %c0_i32 = arith.constant 0 : i32
    %2 = arith.addi %1, %c0_i32 : i32
    %c0_i32_1 = arith.constant 0 : i32
    %3 = arith.addi %2, %c0_i32_1 : i32
    %4 = arith.index_cast %3 : i32 to index
    %5 = memref.load %arg3[%4] : memref<32xf32, #tpu.memory_space<smem>>
    %c4_i32_2 = arith.constant 4 : i32
    %6 = arith.muli %arg0, %c4_i32_2 : i32
    %c4_i32_3 = arith.constant 4 : i32
    %7 = arith.muli %6, %c4_i32_3 : i32
    %c0_i32_4 = arith.constant 0 : i32
    %8 = arith.addi %7, %c0_i32_4 : i32
    %c1_i32 = arith.constant 1 : i32
    %9 = arith.addi %8, %c1_i32 : i32
    %10 = arith.index_cast %9 : i32 to index
    %11 = memref.load %arg3[%10] : memref<32xf32, #tpu.memory_space<smem>>
    %c4_i32_5 = arith.constant 4 : i32
    %12 = arith.muli %arg0, %c4_i32_5 : i32
    %c4_i32_6 = arith.constant 4 : i32
    %13 = arith.muli %12, %c4_i32_6 : i32
    %c0_i32_7 = arith.constant 0 : i32
    %14 = arith.addi %13, %c0_i32_7 : i32
    %c2_i32 = arith.constant 2 : i32
    %15 = arith.addi %14, %c2_i32 : i32
    %16 = arith.index_cast %15 : i32 to index
    %17 = memref.load %arg3[%16] : memref<32xf32, #tpu.memory_space<smem>>
    %c4_i32_8 = arith.constant 4 : i32
    %18 = arith.muli %arg0, %c4_i32_8 : i32
    %c4_i32_9 = arith.constant 4 : i32
    %19 = arith.muli %18, %c4_i32_9 : i32
    %c0_i32_10 = arith.constant 0 : i32
    %20 = arith.addi %19, %c0_i32_10 : i32
    %c3_i32 = arith.constant 3 : i32
    %21 = arith.addi %20, %c3_i32 : i32
    %22 = arith.index_cast %21 : i32 to index
    %23 = memref.load %arg3[%22] : memref<32xf32, #tpu.memory_space<smem>>
    %c4_i32_11 = arith.constant 4 : i32
    %24 = arith.muli %arg0, %c4_i32_11 : i32
    %c4_i32_12 = arith.constant 4 : i32
    %25 = arith.muli %24, %c4_i32_12 : i32
    %c4_i32_13 = arith.constant 4 : i32
    %26 = arith.addi %25, %c4_i32_13 : i32
    %c0_i32_14 = arith.constant 0 : i32
    %27 = arith.addi %26, %c0_i32_14 : i32
    %28 = arith.index_cast %27 : i32 to index
    %29 = memref.load %arg3[%28] : memref<32xf32, #tpu.memory_space<smem>>
    %c4_i32_15 = arith.constant 4 : i32
    %30 = arith.muli %arg0, %c4_i32_15 : i32
    %c4_i32_16 = arith.constant 4 : i32
    %31 = arith.muli %30, %c4_i32_16 : i32
    %c4_i32_17 = arith.constant 4 : i32
    %32 = arith.addi %31, %c4_i32_17 : i32
    %c1_i32_18 = arith.constant 1 : i32
    %33 = arith.addi %32, %c1_i32_18 : i32
    %34 = arith.index_cast %33 : i32 to index
    %35 = memref.load %arg3[%34] : memref<32xf32, #tpu.memory_space<smem>>
    %c4_i32_19 = arith.constant 4 : i32
    %36 = arith.muli %arg0, %c4_i32_19 : i32
    %c4_i32_20 = arith.constant 4 : i32
    %37 = arith.muli %36, %c4_i32_20 : i32
    %c4_i32_21 = arith.constant 4 : i32
    %38 = arith.addi %37, %c4_i32_21 : i32
    %c2_i32_22 = arith.constant 2 : i32
    %39 = arith.addi %38, %c2_i32_22 : i32
    %40 = arith.index_cast %39 : i32 to index
    %41 = memref.load %arg3[%40] : memref<32xf32, #tpu.memory_space<smem>>
    %c4_i32_23 = arith.constant 4 : i32
    %42 = arith.muli %arg0, %c4_i32_23 : i32
    %c4_i32_24 = arith.constant 4 : i32
    %43 = arith.muli %42, %c4_i32_24 : i32
    %c4_i32_25 = arith.constant 4 : i32
    %44 = arith.addi %43, %c4_i32_25 : i32
    %c3_i32_26 = arith.constant 3 : i32
    %45 = arith.addi %44, %c3_i32_26 : i32
    %46 = arith.index_cast %45 : i32 to index
    %47 = memref.load %arg3[%46] : memref<32xf32, #tpu.memory_space<smem>>
    %c4_i32_27 = arith.constant 4 : i32
    %48 = arith.muli %arg0, %c4_i32_27 : i32
    %c4_i32_28 = arith.constant 4 : i32
    %49 = arith.muli %48, %c4_i32_28 : i32
    %c8_i32 = arith.constant 8 : i32
    %50 = arith.addi %49, %c8_i32 : i32
    %c0_i32_29 = arith.constant 0 : i32
    %51 = arith.addi %50, %c0_i32_29 : i32
    %52 = arith.index_cast %51 : i32 to index
    %53 = memref.load %arg3[%52] : memref<32xf32, #tpu.memory_space<smem>>
    %c4_i32_30 = arith.constant 4 : i32
    %54 = arith.muli %arg0, %c4_i32_30 : i32
    %c4_i32_31 = arith.constant 4 : i32
    %55 = arith.muli %54, %c4_i32_31 : i32
    %c8_i32_32 = arith.constant 8 : i32
    %56 = arith.addi %55, %c8_i32_32 : i32
    %c1_i32_33 = arith.constant 1 : i32
    %57 = arith.addi %56, %c1_i32_33 : i32
    %58 = arith.index_cast %57 : i32 to index
    %59 = memref.load %arg3[%58] : memref<32xf32, #tpu.memory_space<smem>>
    %c4_i32_34 = arith.constant 4 : i32
    %60 = arith.muli %arg0, %c4_i32_34 : i32
    %c4_i32_35 = arith.constant 4 : i32
    %61 = arith.muli %60, %c4_i32_35 : i32
    %c8_i32_36 = arith.constant 8 : i32
    %62 = arith.addi %61, %c8_i32_36 : i32
    %c2_i32_37 = arith.constant 2 : i32
    %63 = arith.addi %62, %c2_i32_37 : i32
    %64 = arith.index_cast %63 : i32 to index
    %65 = memref.load %arg3[%64] : memref<32xf32, #tpu.memory_space<smem>>
    %c4_i32_38 = arith.constant 4 : i32
    %66 = arith.muli %arg0, %c4_i32_38 : i32
    %c4_i32_39 = arith.constant 4 : i32
    %67 = arith.muli %66, %c4_i32_39 : i32
    %c8_i32_40 = arith.constant 8 : i32
    %68 = arith.addi %67, %c8_i32_40 : i32
    %c3_i32_41 = arith.constant 3 : i32
    %69 = arith.addi %68, %c3_i32_41 : i32
    %70 = arith.index_cast %69 : i32 to index
    %71 = memref.load %arg3[%70] : memref<32xf32, #tpu.memory_space<smem>>
    %c4_i32_42 = arith.constant 4 : i32
    %72 = arith.muli %arg0, %c4_i32_42 : i32
    %c4_i32_43 = arith.constant 4 : i32
    %73 = arith.muli %72, %c4_i32_43 : i32
    %c12_i32 = arith.constant 12 : i32
    %74 = arith.addi %73, %c12_i32 : i32
    %c0_i32_44 = arith.constant 0 : i32
    %75 = arith.addi %74, %c0_i32_44 : i32
    %76 = arith.index_cast %75 : i32 to index
    %77 = memref.load %arg3[%76] : memref<32xf32, #tpu.memory_space<smem>>
    %c4_i32_45 = arith.constant 4 : i32
    %78 = arith.muli %arg0, %c4_i32_45 : i32
    %c4_i32_46 = arith.constant 4 : i32
    %79 = arith.muli %78, %c4_i32_46 : i32
    %c12_i32_47 = arith.constant 12 : i32
    %80 = arith.addi %79, %c12_i32_47 : i32
    %c1_i32_48 = arith.constant 1 : i32
    %81 = arith.addi %80, %c1_i32_48 : i32
    %82 = arith.index_cast %81 : i32 to index
    %83 = memref.load %arg3[%82] : memref<32xf32, #tpu.memory_space<smem>>
    %c4_i32_49 = arith.constant 4 : i32
    %84 = arith.muli %arg0, %c4_i32_49 : i32
    %c4_i32_50 = arith.constant 4 : i32
    %85 = arith.muli %84, %c4_i32_50 : i32
    %c12_i32_51 = arith.constant 12 : i32
    %86 = arith.addi %85, %c12_i32_51 : i32
    %c2_i32_52 = arith.constant 2 : i32
    %87 = arith.addi %86, %c2_i32_52 : i32
    %88 = arith.index_cast %87 : i32 to index
    %89 = memref.load %arg3[%88] : memref<32xf32, #tpu.memory_space<smem>>
    %c4_i32_53 = arith.constant 4 : i32
    %90 = arith.muli %arg0, %c4_i32_53 : i32
    %c4_i32_54 = arith.constant 4 : i32
    %91 = arith.muli %90, %c4_i32_54 : i32
    %c12_i32_55 = arith.constant 12 : i32
    %92 = arith.addi %91, %c12_i32_55 : i32
    %c3_i32_56 = arith.constant 3 : i32
    %93 = arith.addi %92, %c3_i32_56 : i32
    %94 = arith.index_cast %93 : i32 to index
    %95 = memref.load %arg3[%94] : memref<32xf32, #tpu.memory_space<smem>>
    %c4_i32_57 = arith.constant 4 : i32
    %96 = arith.muli %arg0, %c4_i32_57 : i32
    %c0_i32_58 = arith.constant 0 : i32
    %97 = arith.addi %96, %c0_i32_58 : i32
    %98 = arith.index_cast %97 : i32 to index
    %99 = memref.load %arg4[%98] : memref<8xf32, #tpu.memory_space<smem>>
    %c4_i32_59 = arith.constant 4 : i32
    %100 = arith.muli %arg0, %c4_i32_59 : i32
    %c1_i32_60 = arith.constant 1 : i32
    %101 = arith.addi %100, %c1_i32_60 : i32
    %102 = arith.index_cast %101 : i32 to index
    %103 = memref.load %arg4[%102] : memref<8xf32, #tpu.memory_space<smem>>
    %c4_i32_61 = arith.constant 4 : i32
    %104 = arith.muli %arg0, %c4_i32_61 : i32
    %c2_i32_62 = arith.constant 2 : i32
    %105 = arith.addi %104, %c2_i32_62 : i32
    %106 = arith.index_cast %105 : i32 to index
    %107 = memref.load %arg4[%106] : memref<8xf32, #tpu.memory_space<smem>>
    %c4_i32_63 = arith.constant 4 : i32
    %108 = arith.muli %arg0, %c4_i32_63 : i32
    %c3_i32_64 = arith.constant 3 : i32
    %109 = arith.addi %108, %c3_i32_64 : i32
    %110 = arith.index_cast %109 : i32 to index
    %111 = memref.load %arg4[%110] : memref<8xf32, #tpu.memory_space<smem>>
    %c0 = arith.constant 0 : index
    %c0_65 = arith.constant 0 : index
    %c0_66 = arith.constant 0 : index
    %c0_67 = arith.constant 0 : index
    %112 = vector.load %arg2[%c0, %c0_65, %c0_66, %c0_67] : memref<1x4x2x128xf32, #tpu.memory_space<vmem>>, vector<1x4x2x128xf32>
    %113 = vector.shape_cast %112 : vector<1x4x2x128xf32> to vector<4x2x128xf32>
    %114 = arith.mulf %113, %113 : vector<4x2x128xf32>
    %cst = arith.constant dense<0.000000e+00> : vector<2x128xf32>
    %115 = vector.multi_reduction <add>, %114, %cst [0] : vector<4x2x128xf32> to vector<2x128xf32>
    %cst_68 = arith.constant 1.000000e-24 : f32
    %116 = vector.broadcast %cst_68 : f32 to vector<2x128xf32>
    %117 = arith.maximumf %115, %116 : vector<2x128xf32>
    %118 = math.rsqrt %117 : vector<2x128xf32>
    %119 = vector.shape_cast %118 : vector<2x128xf32> to vector<1x2x128xf32>
    %120 = vector.broadcast %119 : vector<1x2x128xf32> to vector<4x2x128xf32>
    %121 = arith.mulf %113, %120 : vector<4x2x128xf32>
    %122 = vector.extract_strided_slice %121 {offsets = [0, 0, 0], sizes = [1, 2, 128], strides = [1, 1, 1]} : vector<4x2x128xf32> to vector<1x2x128xf32>
    %123 = vector.shape_cast %122 : vector<1x2x128xf32> to vector<2x128xf32>
    %124 = vector.broadcast %5 : f32 to vector<2x128xf32>
    %125 = arith.mulf %124, %123 : vector<2x128xf32>
    %126 = vector.broadcast %99 : f32 to vector<2x128xf32>
    %127 = arith.addf %126, %125 : vector<2x128xf32>
    %128 = vector.extract_strided_slice %121 {offsets = [1, 0, 0], sizes = [1, 2, 128], strides = [1, 1, 1]} : vector<4x2x128xf32> to vector<1x2x128xf32>
    %129 = vector.shape_cast %128 : vector<1x2x128xf32> to vector<2x128xf32>
    %130 = vector.broadcast %11 : f32 to vector<2x128xf32>
    %131 = arith.mulf %130, %129 : vector<2x128xf32>
    %132 = arith.addf %127, %131 : vector<2x128xf32>
    %133 = vector.extract_strided_slice %121 {offsets = [2, 0, 0], sizes = [1, 2, 128], strides = [1, 1, 1]} : vector<4x2x128xf32> to vector<1x2x128xf32>
    %134 = vector.shape_cast %133 : vector<1x2x128xf32> to vector<2x128xf32>
    %135 = vector.broadcast %17 : f32 to vector<2x128xf32>
    %136 = arith.mulf %135, %134 : vector<2x128xf32>
    %137 = arith.addf %132, %136 : vector<2x128xf32>
    %138 = vector.extract_strided_slice %121 {offsets = [3, 0, 0], sizes = [1, 2, 128], strides = [1, 1, 1]} : vector<4x2x128xf32> to vector<1x2x128xf32>
    %139 = vector.shape_cast %138 : vector<1x2x128xf32> to vector<2x128xf32>
    %140 = vector.broadcast %23 : f32 to vector<2x128xf32>
    %141 = arith.mulf %140, %139 : vector<2x128xf32>
    %142 = arith.addf %137, %141 : vector<2x128xf32>
    %143 = vector.extract_strided_slice %113 {offsets = [0, 0, 0], sizes = [1, 2, 128], strides = [1, 1, 1]} : vector<4x2x128xf32> to vector<1x2x128xf32>
    %144 = vector.shape_cast %143 : vector<1x2x128xf32> to vector<2x128xf32>
    %145 = arith.addf %142, %144 : vector<2x128xf32>
    %c0_69 = arith.constant 0 : index
    %c0_70 = arith.constant 0 : index
    %c0_71 = arith.constant 0 : index
    %c0_72 = arith.constant 0 : index
    %146 = vector.load %arg5[%c0_69, %c0_70, %c0_71, %c0_72] : memref<1x4x2x128xf32, #tpu.memory_space<vmem>>, vector<1x1x2x128xf32>
    %147 = vector.shape_cast %146 : vector<1x1x2x128xf32> to vector<2x128xf32>
    %148 = vector.shape_cast %145 : vector<2x128xf32> to vector<1x1x2x128xf32>
    tpu.vector_store %arg5[%c0_69, %c0_70, %c0_71, %c0_72], %148 {strides = array<i32>} : memref<1x4x2x128xf32, #tpu.memory_space<vmem>>, vector<1x1x2x128xf32>,
    %149 = vector.extract_strided_slice %121 {offsets = [0, 0, 0], sizes = [1, 2, 128], strides = [1, 1, 1]} : vector<4x2x128xf32> to vector<1x2x128xf32>
    %150 = vector.shape_cast %149 : vector<1x2x128xf32> to vector<2x128xf32>
    %151 = vector.broadcast %29 : f32 to vector<2x128xf32>
    %152 = arith.mulf %151, %150 : vector<2x128xf32>
    %153 = vector.broadcast %103 : f32 to vector<2x128xf32>
    %154 = arith.addf %153, %152 : vector<2x128xf32>
    %155 = vector.extract_strided_slice %121 {offsets = [1, 0, 0], sizes = [1, 2, 128], strides = [1, 1, 1]} : vector<4x2x128xf32> to vector<1x2x128xf32>
    %156 = vector.shape_cast %155 : vector<1x2x128xf32> to vector<2x128xf32>
    %157 = vector.broadcast %35 : f32 to vector<2x128xf32>
    %158 = arith.mulf %157, %156 : vector<2x128xf32>
    %159 = arith.addf %154, %158 : vector<2x128xf32>
    %160 = vector.extract_strided_slice %121 {offsets = [2, 0, 0], sizes = [1, 2, 128], strides = [1, 1, 1]} : vector<4x2x128xf32> to vector<1x2x128xf32>
    %161 = vector.shape_cast %160 : vector<1x2x128xf32> to vector<2x128xf32>
    %162 = vector.broadcast %41 : f32 to vector<2x128xf32>
    %163 = arith.mulf %162, %161 : vector<2x128xf32>
    %164 = arith.addf %159, %163 : vector<2x128xf32>
    %165 = vector.extract_strided_slice %121 {offsets = [3, 0, 0], sizes = [1, 2, 128], strides = [1, 1, 1]} : vector<4x2x128xf32> to vector<1x2x128xf32>
    %166 = vector.shape_cast %165 : vector<1x2x128xf32> to vector<2x128xf32>
    %167 = vector.broadcast %47 : f32 to vector<2x128xf32>
    %168 = arith.mulf %167, %166 : vector<2x128xf32>
    %169 = arith.addf %164, %168 : vector<2x128xf32>
    %170 = vector.extract_strided_slice %113 {offsets = [1, 0, 0], sizes = [1, 2, 128], strides = [1, 1, 1]} : vector<4x2x128xf32> to vector<1x2x128xf32>
    %171 = vector.shape_cast %170 : vector<1x2x128xf32> to vector<2x128xf32>
    %172 = arith.addf %169, %171 : vector<2x128xf32>
    %c0_73 = arith.constant 0 : index
    %c1 = arith.constant 1 : index
    %c0_74 = arith.constant 0 : index
    %c0_75 = arith.constant 0 : index
    %173 = vector.load %arg5[%c0_73, %c1, %c0_74, %c0_75] : memref<1x4x2x128xf32, #tpu.memory_space<vmem>>, vector<1x1x2x128xf32>
    %174 = vector.shape_cast %173 : vector<1x1x2x128xf32> to vector<2x128xf32>
    %175 = vector.shape_cast %172 : vector<2x128xf32> to vector<1x1x2x128xf32>
    tpu.vector_store %arg5[%c0_73, %c1, %c0_74, %c0_75], %175 {strides = array<i32>} : memref<1x4x2x128xf32, #tpu.memory_space<vmem>>, vector<1x1x2x128xf32>,
    %176 = vector.extract_strided_slice %121 {offsets = [0, 0, 0], sizes = [1, 2, 128], strides = [1, 1, 1]} : vector<4x2x128xf32> to vector<1x2x128xf32>
    %177 = vector.shape_cast %176 : vector<1x2x128xf32> to vector<2x128xf32>
    %178 = vector.broadcast %53 : f32 to vector<2x128xf32>
    %179 = arith.mulf %178, %177 : vector<2x128xf32>
    %180 = vector.broadcast %107 : f32 to vector<2x128xf32>
    %181 = arith.addf %180, %179 : vector<2x128xf32>
    %182 = vector.extract_strided_slice %121 {offsets = [1, 0, 0], sizes = [1, 2, 128], strides = [1, 1, 1]} : vector<4x2x128xf32> to vector<1x2x128xf32>
    %183 = vector.shape_cast %182 : vector<1x2x128xf32> to vector<2x128xf32>
    %184 = vector.broadcast %59 : f32 to vector<2x128xf32>
    %185 = arith.mulf %184, %183 : vector<2x128xf32>
    %186 = arith.addf %181, %185 : vector<2x128xf32>
    %187 = vector.extract_strided_slice %121 {offsets = [2, 0, 0], sizes = [1, 2, 128], strides = [1, 1, 1]} : vector<4x2x128xf32> to vector<1x2x128xf32>
    %188 = vector.shape_cast %187 : vector<1x2x128xf32> to vector<2x128xf32>
    %189 = vector.broadcast %65 : f32 to vector<2x128xf32>
    %190 = arith.mulf %189, %188 : vector<2x128xf32>
    %191 = arith.addf %186, %190 : vector<2x128xf32>
    %192 = vector.extract_strided_slice %121 {offsets = [3, 0, 0], sizes = [1, 2, 128], strides = [1, 1, 1]} : vector<4x2x128xf32> to vector<1x2x128xf32>
    %193 = vector.shape_cast %192 : vector<1x2x128xf32> to vector<2x128xf32>
    %194 = vector.broadcast %71 : f32 to vector<2x128xf32>
    %195 = arith.mulf %194, %193 : vector<2x128xf32>
    %196 = arith.addf %191, %195 : vector<2x128xf32>
    %197 = vector.extract_strided_slice %113 {offsets = [2, 0, 0], sizes = [1, 2, 128], strides = [1, 1, 1]} : vector<4x2x128xf32> to vector<1x2x128xf32>
    %198 = vector.shape_cast %197 : vector<1x2x128xf32> to vector<2x128xf32>
    %199 = arith.addf %196, %198 : vector<2x128xf32>
    %c0_76 = arith.constant 0 : index
    %c2 = arith.constant 2 : index
    %c0_77 = arith.constant 0 : index
    %c0_78 = arith.constant 0 : index
    %200 = vector.load %arg5[%c0_76, %c2, %c0_77, %c0_78] : memref<1x4x2x128xf32, #tpu.memory_space<vmem>>, vector<1x1x2x128xf32>
    %201 = vector.shape_cast %200 : vector<1x1x2x128xf32> to vector<2x128xf32>
    %202 = vector.shape_cast %199 : vector<2x128xf32> to vector<1x1x2x128xf32>
    tpu.vector_store %arg5[%c0_76, %c2, %c0_77, %c0_78], %202 {strides = array<i32>} : memref<1x4x2x128xf32, #tpu.memory_space<vmem>>, vector<1x1x2x128xf32>,
    %203 = vector.extract_strided_slice %121 {offsets = [0, 0, 0], sizes = [1, 2, 128], strides = [1, 1, 1]} : vector<4x2x128xf32> to vector<1x2x128xf32>
    %204 = vector.shape_cast %203 : vector<1x2x128xf32> to vector<2x128xf32>
    %205 = vector.broadcast %77 : f32 to vector<2x128xf32>
    %206 = arith.mulf %205, %204 : vector<2x128xf32>
    %207 = vector.broadcast %111 : f32 to vector<2x128xf32>
    %208 = arith.addf %207, %206 : vector<2x128xf32>
    %209 = vector.extract_strided_slice %121 {offsets = [1, 0, 0], sizes = [1, 2, 128], strides = [1, 1, 1]} : vector<4x2x128xf32> to vector<1x2x128xf32>
    %210 = vector.shape_cast %209 : vector<1x2x128xf32> to vector<2x128xf32>
    %211 = vector.broadcast %83 : f32 to vector<2x128xf32>
    %212 = arith.mulf %211, %210 : vector<2x128xf32>
    %213 = arith.addf %208, %212 : vector<2x128xf32>
    %214 = vector.extract_strided_slice %121 {offsets = [2, 0, 0], sizes = [1, 2, 128], strides = [1, 1, 1]} : vector<4x2x128xf32> to vector<1x2x128xf32>
    %215 = vector.shape_cast %214 : vector<1x2x128xf32> to vector<2x128xf32>
    %216 = vector.broadcast %89 : f32 to vector<2x128xf32>
    %217 = arith.mulf %216, %215 : vector<2x128xf32>
    %218 = arith.addf %213, %217 : vector<2x128xf32>
    %219 = vector.extract_strided_slice %121 {offsets = [3, 0, 0], sizes = [1, 2, 128], strides = [1, 1, 1]} : vector<4x2x128xf32> to vector<1x2x128xf32>
    %220 = vector.shape_cast %219 : vector<1x2x128xf32> to vector<2x128xf32>
    %221 = vector.broadcast %95 : f32 to vector<2x128xf32>
    %222 = arith.mulf %221, %220 : vector<2x128xf32>
    %223 = arith.addf %218, %222 : vector<2x128xf32>
    %224 = vector.extract_strided_slice %113 {offsets = [3, 0, 0], sizes = [1, 2, 128], strides = [1, 1, 1]} : vector<4x2x128xf32> to vector<1x2x128xf32>
    %225 = vector.shape_cast %224 : vector<1x2x128xf32> to vector<2x128xf32>
    %226 = arith.addf %223, %225 : vector<2x128xf32>
    %c0_79 = arith.constant 0 : index
    %c3 = arith.constant 3 : index
    %c0_80 = arith.constant 0 : index
    %c0_81 = arith.constant 0 : index
    %227 = vector.load %arg5[%c0_79, %c3, %c0_80, %c0_81] : memref<1x4x2x128xf32, #tpu.memory_space<vmem>>, vector<1x1x2x128xf32>
    %228 = vector.shape_cast %227 : vector<1x1x2x128xf32> to vector<2x128xf32>
    %229 = vector.shape_cast %226 : vector<2x128xf32> to vector<1x1x2x128xf32>
    tpu.vector_store %arg5[%c0_79, %c3, %c0_80, %c0_81], %229 {strides = array<i32>} : memref<1x4x2x128xf32, #tpu.memory_space<vmem>>, vector<1x1x2x128xf32>,
    return
  }
  func.func @transform_0(%arg0: i32, %arg1: i32) -> (i32, i32, i32, i32) {
    %c0_i32 = arith.constant 0 : i32
    %c0_i32_0 = arith.constant 0 : i32
    %c0_i32_1 = arith.constant 0 : i32
    return %arg0, %c0_i32, %arg1, %c0_i32_0 : i32, i32, i32, i32
  }
  func.func @transform_1(%arg0: i32, %arg1: i32) -> i32 {
    %c0_i32 = arith.constant 0 : i32
    %c0_i32_0 = arith.constant 0 : i32
    return %c0_i32 : i32
  }
  func.func @transform_2(%arg0: i32, %arg1: i32) -> i32 {
    %c0_i32 = arith.constant 0 : i32
    %c0_i32_0 = arith.constant 0 : i32
    return %c0_i32 : i32
  }
  func.func @transform_3(%arg0: i32, %arg1: i32) -> (i32, i32, i32, i32) {
    %c0_i32 = arith.constant 0 : i32
    %c0_i32_0 = arith.constant 0 : i32
    %c0_i32_1 = arith.constant 0 : i32
    return %arg0, %c0_i32, %arg1, %c0_i32_0 : i32, i32, i32, i32
  }
}

</mosaic_0001>

<bundles_post_ra>
// kernel: tpu_custom_call.1
= control target key start
LH: loop header
LB: loop body
LE: loop exit
PB: predicated region body
PF: predicated region fallthrough
CT: control target
= control target key end

     0   :  { %s1104_s0 = inlined_call_operand.hbm [shape: f32[2,4,2,128], index: 0, kind: input, shape index: {}]   ;;  %s1105_s1 = inlined_call_operand.vmem [shape: f32[32], index: 1, kind: input, shape index: {}]   ;;  %s1106_s2 = inlined_call_operand.vmem [shape: f32[8], index: 2, kind: input, shape index: {}]   ;;  %s1107_s3 = inlined_call_operand.hbm [shape: f32[2,4,2,128], index: 3, kind: output, shape index: {}]  }
   0x1   :  { %1121 = sst [smem:[#allocation20_spill]] %s1104_s0 }
   0x2   :  { %1122 = sst [smem:[#allocation21_spill]] %s1105_s1 }
   0x3   :  { %1123 = sst [smem:[#allocation22_spill]] %s1106_s2 }
   0x4   :  { %8 = vsyncpa [#allocation3], 0 }
   0x5   :  { %10 = vsyncpa [#allocation3 + $0x1], 0 }
   0x6   :  { %11 = vsyncpa [#allocation5], 0 }
   0x7   :  { %12 = vsyncpa [#allocation8], 0 }
   0x8   :  { %13 = vsyncpa [#allocation4], 0 }
   0x9   :  { %15 = vsyncpa [#allocation4 + $0x1], 0  ;;  %s775_s12 = smov 0   ;;  %s777_s13 = smov 0  }
   0xa   :  { %s779_s14 = smov 0   ;;  %s781_s15 = smov 0  }
   0xb   :  { %s783_s16 = smov 0   ;;  %s785_s17 = smov 0  }
   0xc LB: > { %1124 = sst [smem:[#allocation14_spill]] %s729_s13  ;;  %s480_s18 = sadd.s32 4294967295, %s745_s17   ;;  %s745_s17 = sphi %s785_s17, %s21_s17   ;;  %s741_s16 = sphi %s783_s16, %s1154_s16   ;;  %s737_s15 = sphi %s781_s15, %s1153_s15   ;;  %s733_s14 = sphi %s779_s14, %s1152_s14   ;;  %s729_s13 = sphi %s777_s13, %s1151_s13   ;;  %s725_s12 = sphi %s775_s12, %s1150_s12  }
   0xd   : > { %1125 = sst [smem:[#allocation15_spill]] %s733_s14  ;;  %s481_s19 = sadd.s32 4294967294, %s745_s17  }
   0xe   : > { %1126 = sst [smem:[#allocation16_spill]] %s741_s16  ;;  %s42_s20 = sadd.s32 1, %s733_s14 }
   0xf   : > { %1127 = sst [smem:[#allocation17_spill]] %s745_s17  ;;  %p49_p0 = scmp.ne.s32.totalorder %s733_s14, %s729_s13 }
  0x10   : > { %p50_p1 = scmp.eq.s32.totalorder %s745_s17, 0  ;;  %p55_p2 = scmp.ne.s32.totalorder %s729_s13, %s725_s12 }
  0x11   : > { %p813_p3 = scmp.eq.s32.totalorder %s480_s18, 0  ;;  %p123_p4 = scmp.eq.s32.totalorder %s480_s18, 1 }
  0x12   : > { %p817_p5 = por %p50_p1, %p49_p0  ;;  %p129_p6 = scmp.eq.s32.totalorder %s481_s19, 1 }
  0x13   : > { %s1128_s21 = scalar_select %p813_p3, 1, 0 }
  0x14   : > { %p823_p7 = por %p813_p3, %p55_p2  ;;  %p827_p8 = por %p123_p4, %p49_p0 }
  0x15   : > { %p831_p9 = por %p129_p6, %p55_p2  ;;  %p482_p10 = scmp.ge.s32.totalorder %s745_s17, 1 }
  0x16   : > { %s1130_s23 = scalar_select %p823_p7, 1, 0 }
  0x17   : > { %s1131_s24 = scalar_select %p827_p8, 1, 0 }
  0x18   : > { %s1132_s25 = scalar_select %p831_p9, 1, 0 }
  0x19   : > { %p136_p11 = scmp.lt.s32.totalorder %s745_s17, 3  ;;  %s1133_s1 = sld [smem:[#allocation21_spill]] }
  0x1a   : > { %p535_p0 = scmp.lt.s32.totalorder %s745_s17, 2  ;;  %s1135_s2 = sld [smem:[#allocation22_spill]] }
  0x1b   : > { %p840_p12 = pnand %p482_p10, %p136_p11 }
  0x1c   : > { %p853_p2 = pnand %p535_p0, %p817_p5 }
  0x1d   : > { %s1134_s29 = scalar_select %p840_p12, 1, 0 }
  0x1e   : > { %p518_p1 = pneg %p840_p12 }
  0x1f   : > { %s149_s28 = sshll.u32 %s1133_s1, 4  ;;  %s150_s28 = int_to_ptr.vmem [resolvable:$true] %s149_s28 }
  0x20   : > { %s160_s5 = sshll.u32 %s1135_s2, 4  ;;  %p859_p4 = pnand %p518_p1, %p813_p3  ;;  %s161_s5 = int_to_ptr.vmem [resolvable:$true] %s160_s5 }
  0x21   : > { %s1136_s6 = scalar_select %p853_p2, 1, 0 }
  0x22   : > { %s595_s8 = scalar_lea.vmem %s150_s28, 16  ;;  %p597_p10 = pneg %p859_p4 }
  0x23   : > { %p596_p6 = scmp.ne.s32.totalorder %s150_s28, %s595_s8  ;;  %p603_p9 = scmp.lt.s32.totalorder %s150_s28, %s150_s28 }
  0x24   : > { %p604_p8 = scmp.lt.s32.totalorder %s595_s8, %s595_s8 }
  0x25   : > { %p598_p11 = pnand %p597_p10, %p596_p6 }
  0x26   : > { %p605_p7 = por %p604_p8, %p603_p9 }
  0x27   : > { %p599_p13 = pneg %p598_p11 }
  0x29   : > { %p606_p5 = pnand %p605_p7, %p599_p13 }
  0x2b   : > { %609 = shalt.err (!%p606_p5)
}
  0x2c   : > { %s747_s9 = smov [#allocation6]   ;;  %s610_s10 = scalar_lea.vmem %s161_s5, 16 }
  0x2d   : > { %521 = dma.vmem_to_smem (!%p859_p4), %s150_s28, 16, %s747_s9, [#allocation5]  }
  0x2e   : > { %p611_p0 = scmp.ne.s32.totalorder %s161_s5, %s610_s10  ;;  %p618_p12 = scmp.lt.s32.totalorder %s161_s5, %s161_s5 }
  0x2f   : > { %p619_p2 = scmp.lt.s32.totalorder %s610_s10, %s610_s10 }
  0x30   : > { %p613_p1 = pnand %p611_p0, %p597_p10 }
  0x31   : > { %p620_p6 = por %p619_p2, %p618_p12 }
  0x32   : > { %p614_p3 = pneg %p613_p1 }
  0x34   : > { %p621_p11 = pnand %p620_p6, %p614_p3 }
  0x36   : > { %624 = shalt.err (!%p621_p11)
}
  0x37   : > { %s748_s11 = smov [#allocation7]   ;;  %s33_s18 = sadd.s32 1, %s741_s16 }
  0x38   : > { %524 = dma.vmem_to_smem (!%p859_p4), %s161_s5, 16, %s748_s11, [#allocation8]  }
  0x39   : > { %s171_s19 = sand.u32 1, %s733_s14   ;;  %p35_p7 = scmp.ge.s32.totalorder %s33_s18, 2 }
  0x3a   : > { %s486_s22 = sshll.u32 %s171_s19, 3  ;;  %s504_s26 = sshll.u32 %s741_s16, 7 }
  0x3b   : > { %s1156_s18 = smov (%p35_p7, %s33_s18), 0  ;;  %s1139_s0 = sld [smem:[#allocation20_spill]] }
  0x3c   : > { %1138 = sst [smem:[#allocation18_spill]] %s1156_s18  ;;  %s37_s4 = ssub.s32 %s741_s16, %s1156_s18 }
  0x3d   : > { %s175_s5 = scalar_lea.vmem [#allocation2], %s486_s22  ;;  %p40_p3 = scmp.eq.s32.totalorder %s37_s4, 0 }
  0x3e   : > { %s183_s7 = sshll.u32 %s175_s5, 4  ;;  %s888_s9 = scalar_lea.sflag [#allocation3], %s171_s19  ;;  %s881_s7 = int_to_ptr.vmem [resolvable:$true] %s183_s7 }
  0x3f   : > { %s886_s8 = scalar_select %p40_p3, %s733_s14, %s42_s20  }
  0x40   : > { %p1141_p9 = scmp.ne.s32.totalorder %s1136_s6, 0 }
  0x41   : > { %s877_s30 = scalar_lea.hbm %s1139_s0, %s504_s26  ;;  %1140 = sst [smem:[#allocation19_spill]] %s886_s8 }
  0x42   : > { %s625_s10 = scalar_lea.hbm %s877_s30, 128  ;;  %p627_p12 = pneg %p1141_p9 }
  0x43   : > { %p626_p8 = scmp.ne.s32.totalorder %s877_s30, %s625_s10  ;;  %s630_s22 = scalar_lea.hbm %s1139_s0, 256 }
  0x44   : > { %p631_p4 = scmp.lt.u32.totalorder %s877_s30, %s1139_s0  ;;  %p632_p10 = scmp.lt.u32.totalorder %s630_s22, %s625_s10 }
  0x45   : > { %p628_p13 = pnand %p627_p12, %p626_p8  ;;  %p634_p0 = scmp.lt.u32.totalorder %s625_s10, %s877_s30 }
  0x46   : > { %p633_p5 = por %p632_p10, %p631_p4 }
  0x47   : > { %p629_p2 = pneg %p628_p13 }
  0x48   : > { %p635_p1 = por %p634_p0, %p633_p5 }
  0x4a   : > { %p636_p6 = pnand %p635_p1, %p629_p2 }
  0x4c   : > { %639 = shalt.err (!%p636_p6)
}
  0x4d   : > { %s640_s20 = scalar_lea.vmem %s881_s7, 128  ;;  %s749_s19 = smov [#allocation2]  }
  0x4e   : > { %p641_p11 = scmp.ne.s32.totalorder %s881_s7, %s640_s20  ;;  %s645_s4 = sshll.u32 %s749_s19, 4  ;;  %s646_s4 = int_to_ptr.vmem [resolvable:$false] %s645_s4 }
  0x4f   : > { %s647_s5 = scalar_lea.vmem %s646_s4, 256  ;;  %p648_p8 = scmp.lt.s32.totalorder %s881_s7, %s646_s4 }
  0x50   : > { %p643_p7 = pnand %p641_p11, %p627_p12  ;;  %p649_p13 = scmp.lt.s32.totalorder %s647_s5, %s640_s20 }
  0x52   : > { %p644_p3 = pneg %p643_p7  ;;  %p650_p4 = por %p649_p13, %p648_p8 }
  0x54   : > { %p651_p10 = pnand %p650_p4, %p644_p3 }
  0x56   : > { %654 = shalt.err (!%p651_p10)
}
  0x57   : > { %s750_s10 = smov 32   ;;  %s751_s11 = smov 2  }
  0x58   : > { %528 = dma.hbm_to_vmem [thread:$0]  (!%p1141_p9), %s877_s30, 128, %s881_s7, %s888_s9, %s750_s10, %s750_s10, %s751_s11  }
  0x59   : > { %p1142_p12 = scmp.ne.s32.totalorder %s1134_s29, 0 }
  0x5a   : > { %s919_s26 = sand.u32 (!%p1142_p12), 1, %s729_s13   ;;  %p1143_p2 = scmp.ne.s32.totalorder (!%p1142_p12), %s1130_s23, 0 }
  0x5b   : > { %195 = sbr.rel (%p1142_p12) target bundleno = 161 (0xa1), region = 32  ;;  %s1114_s22 = sshll.u32 (!%p1142_p12), %s919_s26, 3 }
  0x5c   : > { %s198_s27 = scalar_lea.sflag (!%p1142_p12), [#allocation3], %s919_s26  ;;  %s201_s28 = scalar_lea.vmem (!%p1142_p12), [#allocation2], %s1114_s22 }
  0x62   : > { %708 = dma.done.wait (%p1143_p2), %s198_s27, 128  }
  0x63   : > { %710 = vsyncadd (%p1143_p2), %s198_s27, 4294967168  ;;  %p1144_p9 = scmp.ne.s32.totalorder %s1128_s21, 0 }
  0x65   : > { %712 = dma.done.wait (%p1144_p9), [#allocation5], 16  }
  0x66   : > { %714 = vsyncadd (%p1144_p9), [#allocation5], 4294967280 }
  0x67   : > { %716 = dma.done.wait (%p1144_p9), [#allocation8], 16  }
  0x68   : > { %718 = vsyncadd (%p1144_p9), [#allocation8], 4294967280 }
  0x69   : > { %214 = sfence }
  0x6a   : > { %s938_s29 = sshll.u32 %s737_s15, 4  ;;  %v940_v0 = vld [vmem:[%s201_s28] sm:$0x3]  ;;  %v942_v1 = vld [vmem:[%s201_s28 + $0x2] sm:$0x3]  ;;  %vm281_vm0 = vcmask 1041408  }
  0x6b   : > { %s235_s23 = sadd.s32 1, %s938_s29  ;;  %v945_v2 = vld [vmem:[%s201_s28 + $0x4] sm:$0x3]  ;;  %v947_v3 = vld [vmem:[%s201_s28 + $0x6] sm:$0x3]  ;;  %v277_v4 = vmul.f32 %v940_v0, %v940_v0  ;;  %v278_v5 = vmul.f32 %v942_v1, %v942_v1  ;;  %s237_s21 = sadd.s32 2, %s938_s29 }
  0x6c   : > { %v279_v6 = vmul.f32 %v945_v2, %v945_v2  ;;  %v280_v7 = vmul.f32 %v947_v3, %v947_v3  ;;  %s959_s6 = sld [smem:[#allocation6 + %s938_s29]]  ;;  %s239_s30 = sadd.s32 3, %s938_s29 }
  0x6d   : > { %v282_v8 = vsel %vm281_vm0, %v277_v4, 0.0  ;;  %v283_v9 = vsel %vm281_vm0, %v278_v5, 0.0  ;;  %s962_s7 = sld [smem:[#allocation6 + %s235_s23]]  ;;  %s965_s9 = sshll.u32 %s737_s15, 2 }
  0x6e   : > { %v284_v10 = vadd.f32 %v283_v9, %v282_v8  ;;  %v285_v11 = vsel %vm281_vm0, %v279_v6, 0.0  ;;  %s967_s20 = sld [smem:[#allocation6 + %s237_s21]]  ;;  %v287_v12 = vsel %vm281_vm0, %v280_v7, 0.0  ;;  %s241_s5 = sadd.s32 4, %s938_s29 }
  0x6f   : > { %s969_s19 = sld [smem:[#allocation6 + %s239_s30]]  ;;  %s243_s11 = sadd.s32 5, %s938_s29 }
  0x70   : > { %s972_s4 = sld [smem:[#allocation7 + %s965_s9]]  ;;  %v286_v13 = vadd.f32 %v285_v11, %v284_v10  ;;  %s245_s28 = sadd.s32 6, %s938_s29 }
  0x71   : > { %s975_s10 = sld [smem:[#allocation6 + %s241_s5]]  ;;  %s247_s21 = sadd.s32 7, %s938_s29 }
  0x72   : > { %v288_v14 = vadd.f32 %v287_v12, %v286_v13  ;;  %s978_s27 = sld [smem:[#allocation6 + %s243_s11]]  ;;  %s267_s22 = sadd.s32 1, %s965_s9  ;;  %v295_v16 = vstv %s959_s6 }
  0x73   : > { %s981_s23 = sld [smem:[#allocation6 + %s245_s28]]  ;;  %s249_s5 = sadd.s32 8, %s938_s29  ;;  %v299_v17 = vstv %s962_s7 }
  0x74   : > { %v289_v15 = vmax.f32 %v288_v14, 1e-24  ;;  %s984_s30 = sld [smem:[#allocation6 + %s247_s21]]  ;;  %s251_s1 = sadd.s32 9, %s938_s29  ;;  %v302_v18 = vstv %s967_s20 }
  0x75   : > { %s987_s0 = sld [smem:[#allocation7 + %s267_s22]]  ;;  %s253_s2 = sadd.s32 10, %s938_s29  ;;  %v305_v19 = vstv %s969_s19 }
  0x76   : > { %593 = vrsqrt.f32 %v289_v15  ;;  %s990_s11 = sld [smem:[#allocation6 + %s249_s5]]  ;;  %s255_s22 = sadd.s32 11, %s938_s29  ;;  %v297_v20 = vstv %s972_s4 }
  0x77   : > { %s993_s28 = sld [smem:[#allocation6 + %s251_s1]]  ;;  %s269_s16 = sadd.s32 2, %s965_s9  ;;  %v310_v21 = vstv %s975_s10 }
  0x78   : > { %s996_s21 = sld [smem:[#allocation6 + %s253_s2]]  ;;  %s257_s8 = sadd.s32 12, %s938_s29  ;;  %v314_v22 = vstv %s978_s27 }
  0x79   : > { %s999_s18 = sld [smem:[#allocation6 + %s255_s22]]  ;;  %s259_s1 = sadd.s32 13, %s938_s29  ;;  %v317_v23 = vstv %s981_s23 }
  0x7a   : > { %s1002_s5 = sld [smem:[#allocation7 + %s269_s16]]  ;;  %s261_s2 = sadd.s32 14, %s938_s29  ;;  %v320_v26 = vstv %s984_s30 }
  0x7b   : > { %s1005_s14 = sld [smem:[#allocation6 + %s257_s8]]  ;;  %s263_s17 = sadd.s32 15, %s938_s29  ;;  %v312_v25 = vstv %s987_s0 }
  0x7c   : > { %s1008_s13 = sld [smem:[#allocation6 + %s259_s1]]  ;;  %s271_s22 = sadd.s32 3, %s965_s9  ;;  %v326_v27 = vstv %s990_s11 }
  0x7d   : > { %s1021_s16 = sld [smem:[#allocation6 + %s261_s2]]  ;;  %v330_v28 = vstv %s993_s28  ;;  %s1145_s0 = sshll.u32 %s919_s26, 3 }
  0x7e   : > { %s1023_s8 = sld [smem:[#allocation7 + %s271_s22]]  ;;  %v333_v34 = vstv %s996_s21  ;;  %p1146_p0 = scmp.ne.s32.totalorder %s1131_s24, 0 }
  0x7f   : > { %s1029_s29 = sld [smem:[#allocation6 + %s263_s17]]  ;;  %v336_v35 = vstv %s999_s18  ;;  %s505_s17 = sshll.u32 %s737_s15, 7 }
  0x80   : > { %v594_v24 = vpop.eup %593  ;;  %v328_v33 = vstv %s1002_s5  ;;  %s1055_s7 = scalar_lea.hbm %s1107_s3, %s505_s17  ;;  %s359_s15 = scalar_lea.sflag [#allocation4], %s919_s26 }
  0x81   : > { %v291_v29 = vmul.f32 %v594_v24, %v940_v0  ;;  %v292_v30 = vmul.f32 %v594_v24, %v942_v1  ;;  %v293_v31 = vmul.f32 %v594_v24, %v945_v2  ;;  %v294_v32 = vmul.f32 %v594_v24, %v947_v3  ;;  %s752_s20 = smov [#allocation9]  }
  0x82   : > { %v342_v36 = vstv %s1005_s14  ;;  %v346_v40 = vstv %s1008_s13  ;;  %s232_s13 = scalar_lea.vmem [#allocation9], %s1145_s0  ;;  %s659_s19 = sshll.u32 %s752_s20, 4  ;;  %s660_s19 = int_to_ptr.vmem [resolvable:$false] %s659_s19 }
  0x83   : > { %v296_v37 = vmul.f32 %v295_v16, %v291_v29  ;;  %v300_v38 = vmul.f32 %v299_v17, %v292_v30  ;;  %v303_v39 = vmul.f32 %v302_v18, %v293_v31  ;;  %v306_v41 = vmul.f32 %v305_v19, %v294_v32  ;;  %s373_s14 = sshll.u32 %s232_s13, 4  ;;  %s661_s4 = scalar_lea.vmem %s660_s19, 256  ;;  %s1047_s14 = int_to_ptr.vmem [resolvable:$true] %s373_s14 }
  0x84   : > { %v311_v42 = vmul.f32 %v310_v21, %v291_v29  ;;  %v315_v43 = vmul.f32 %v314_v22, %v292_v30  ;;  %v318_v44 = vmul.f32 %v317_v23, %v293_v31  ;;  %v321_v46 = vmul.f32 %v320_v26, %v294_v32  ;;  %s655_s9 = scalar_lea.vmem %s1047_s14, 128  ;;  %p662_p11 = scmp.lt.s32.totalorder %s1047_s14, %s660_s19 }
  0x85   : > { %v298_v45 = vadd.f32 %v297_v20, %v296_v37  ;;  %v327_v47 = vmul.f32 %v326_v27, %v291_v29  ;;  %v331_v48 = vmul.f32 %v330_v28, %v292_v30  ;;  %v334_v50 = vmul.f32 %v333_v34, %v293_v31  ;;  %p656_p5 = scmp.ne.s32.totalorder %s1047_s14, %s655_s9  ;;  %p663_p7 = scmp.lt.s32.totalorder %s661_s4, %s655_s9 }
  0x86   : > { %v313_v49 = vadd.f32 %v312_v25, %v311_v42  ;;  %v343_v51 = vmul.f32 %v342_v36, %v291_v29  ;;  %v344_v52 = vstv %s1023_s8  ;;  %v347_v55 = vmul.f32 %v346_v40, %v292_v30 }
  0x87   : > { %v301_v53 = vadd.f32 %v300_v38, %v298_v45  ;;  %v329_v54 = vadd.f32 %v328_v33, %v327_v47  ;;  %v349_v56 = vstv %s1021_s16  ;;  %v352_v60 = vstv %s1029_s29  ;;  %p657_p1 = pnand %p656_p5, %p1146_p0  ;;  %p664_p3 = por %p663_p7, %p662_p11 }
  0x88   : > { %v316_v57 = vadd.f32 %v315_v43, %v313_v49  ;;  %v345_v58 = vadd.f32 %v344_v52, %v343_v51  ;;  %v350_v59 = vmul.f32 %v349_v56, %v293_v31  ;;  %v337_v63 = vmul.f32 %v336_v35, %v294_v32 }
  0x89   : > { %v304_v61 = vadd.f32 %v303_v39, %v301_v53  ;;  %v332_v62 = vadd.f32 %v331_v48, %v329_v54  ;;  %v353_v6 = vmul.f32 %v352_v60, %v294_v32  ;;  %p658_p6 = pneg %p657_p1 }
  0x8a   : > { %v319_v4 = vadd.f32 %v318_v44, %v316_v57  ;;  %v348_v5 = vadd.f32 %v347_v55, %v345_v58 }
  0x8b   : > { %v307_v7 = vadd.f32 %v306_v41, %v304_v61  ;;  %v335_v8 = vadd.f32 %v334_v50, %v332_v62  ;;  %p665_p8 = pnand %p664_p3, %p658_p6 }
  0x8c   : > { %v322_v9 = vadd.f32 %v321_v46, %v319_v4  ;;  %v351_v10 = vadd.f32 %v350_v59, %v348_v5 }
  0x8d   : > { %v308_v11 = vadd.f32 %v307_v7, %v940_v0  ;;  %v338_v12 = vadd.f32 %v337_v63, %v335_v8 }
  0x8e   : > { %v323_v13 = vadd.f32 %v322_v9, %v942_v1  ;;  %v354_v14 = vadd.f32 %v353_v6, %v351_v10 }
  0x8f   : > { %309 = vst [vmem:[%s232_s13] sm:$0x3] %v308_v11  ;;  %v339_v15 = vadd.f32 %v338_v12, %v945_v2 }
  0x90   : > { %496 = vst [vmem:[%s232_s13 + $0x2] sm:$0x3] %v323_v13  ;;  %v355_v16 = vadd.f32 %v354_v14, %v947_v3 }
  0x91   : > { %497 = vst [vmem:[%s232_s13 + $0x4] sm:$0x3] %v339_v15 }
  0x92   : > { %498 = vst [vmem:[%s232_s13 + $0x6] sm:$0x3] %v355_v16 }
  0x93   : > { %668 = shalt.err (!%p665_p8)
}
  0x94   : > { %s669_s10 = scalar_lea.hbm %s1055_s7, 128  ;;  %s673_s30 = scalar_lea.hbm %s1107_s3, 256 }
  0x95   : > { %p670_p13 = scmp.ne.s32.totalorder %s1055_s7, %s669_s10  ;;  %p674_p12 = scmp.lt.u32.totalorder %s1055_s7, %s1107_s3 }
  0x96   : > { %p675_p2 = scmp.lt.u32.totalorder %s673_s30, %s669_s10  ;;  %p677_p5 = scmp.lt.u32.totalorder %s669_s10, %s1055_s7 }
  0x97   : > { %p671_p4 = pnand %p670_p13, %p1146_p0 }
  0x98   : > { %p676_p9 = por %p675_p2, %p674_p12 }
  0x99   : > { %p672_p10 = pneg %p671_p4 }
  0x9a   : > { %p678_p1 = por %p677_p5, %p676_p9 }
  0x9c   : > { %p679_p6 = pnand %p678_p1, %p672_p10 }
  0x9e   : > { %682 = shalt.err (!%p679_p6)
}
  0x9f   : > { %s753_s21 = smov 32   ;;  %s754_s5 = smov 2  }
  0xa0   : > { %516 = dma.vmem_to_hbm [thread:$0]  (%p1146_p0), %s1047_s14, 128, %s1055_s7, %s359_s15, %s753_s21, %s753_s21, %s754_s5  }
  0xa1 PF: > { %s1147_s1 = sld [smem:[#allocation17_spill]]  ;;  %s388_s2 = sand.u32 1, %s725_s12  }
  0xa2   : > { %p1148_p11 = scmp.ne.s32.totalorder %s1132_s25, 0  ;;  %s389_s22 = scalar_lea.sflag [#allocation4], %s388_s2 }
  0xa7   : > { %p1149_p7 = scmp.ge.s32.totalorder %s1147_s1, 2 }
  0xa9   : > { %p530_p3 = pnand %p1149_p7, %p1148_p11 }
  0xab   : > { %720 = dma.done.wait (!%p530_p3), %s389_s22, 128  }
  0xac   : > { %722 = vsyncadd (!%p530_p3), %s389_s22, 4294967168  ;;  %s21_s17 = sadd.s32 1, %s1147_s1   ;;  %s1150_s12 = sld [smem:[#allocation14_spill]] }
  0xad   : > { %p18_p8 = scmp.ge.s32.totalorder %s21_s17, 4   ;;  %s1151_s13 = sld [smem:[#allocation15_spill]] }
  0xae   : > { %s1152_s14 = sld [smem:[#allocation19_spill]]  ;;  %s1153_s15 = sld [smem:[#allocation16_spill]] }
  0xaf   : > { %s1154_s16 = sld [smem:[#allocation18_spill]]  ;;  %20 = sbr.rel (!%p18_p8) target bundleno = 12 (0xc), region = 89 }
  0xb6   :  { %394 = vsyncpa [#allocation3], 1 }
  0xb7   :  { %396 = vsyncpa [#allocation3 + $0x1], 1 }
  0xb8   :  { %397 = vsyncpa [#allocation4], 1 }
  0xb9   :  { %399 = vsyncpa [#allocation4 + $0x1], 1 }
  0xba   :  { %400 = vsyncpa [#allocation5], 1 }
  0xbb   :  { %402 = vsyncpa [#allocation5 + $0x1], 1 }
  0xbc   :  { %403 = vsyncpa [#allocation8], 1 }

</bundles_post_ra>
